<compile_context>
chip_gen: v5e
topology: v5e:2x2
jax: 0.10.0
libtpu: 0.0.40
codegen_flags: <defaults>
</compile_context>

<pallas_src>
import math

import jax
import jax.numpy as jnp
from jax import lax
from jax.experimental import pallas as pl
from jax.experimental.pallas import tpu as pltpu

# Small, module-consistent shapes (d_model divisible by num_heads).
B, S, D = 2, 8, 32
NUM_HEADS = 4
HEAD_DIM = D // NUM_HEADS


def reformer_attn_kernel(x_ref, wqkv_ref, bqkv_ref, wo_ref, bo_ref, o_ref):
    """Single invocation over all B*S rows; weights fully resident in VMEM."""
    x = x_ref[...]                                               # (B*S, D) f32

    # Fused Q/K/V projection: one MXU matmul + one bias add.  The 1/sqrt(hd)
    # scale is already folded into the Q columns of wqkv/bqkv by the wrapper.
    qkv = jnp.dot(x, wqkv_ref[...],
                  preferred_element_type=jnp.float32) + bqkv_ref[...]
    q = qkv[:, :D]
    k = qkv[:, D:2 * D]
    v = qkv[:, 2 * D:]

    # Head-batched relayout: (B*S, D) -> (H*B, S, hd).  One lane slice per
    # head per tensor; the reshapes/stack only touch leading dims (sublane
    # tile boundaries align since S == 8), so no minor-dim data movement.
    def split_heads(t):
        heads = [t[:, h * HEAD_DIM:(h + 1) * HEAD_DIM].reshape(B, S, HEAD_DIM)
                 for h in range(NUM_HEADS)]
        return jnp.stack(heads, axis=0).reshape(NUM_HEADS * B, S, HEAD_DIM)

    qh, kh, vh = split_heads(q), split_heads(k), split_heads(v)

    # Scores for all (head, batch) pairs in one batched contraction:
    # (H*B, S, hd) x (H*B, S, hd) -> (H*B, S, S), contracting hd.
    s = lax.dot_general(qh, kh, (((2,), (2,)), ((0,), (0,))),
                        preferred_element_type=jnp.float32)

    # Single softmax pass over the stacked scores (exact reciprocal: EUP has
    # plenty of slack here and it keeps numerics tight vs. the reference).
    s = s - jnp.max(s, axis=-1, keepdims=True)
    p = jnp.exp(s)
    p = p * pl.reciprocal(jnp.sum(p, axis=-1, keepdims=True), approx=False)
    # dropout(p) is identity in inference mode.

    # Context for all (head, batch) pairs: (H*B, S, S) @ (H*B, S, hd).
    ctx = lax.dot_general(p, vh, (((2,), (1,)), ((0,), (0,))),
                          preferred_element_type=jnp.float32)

    # Reassemble heads onto the lane axis once: (H*B, S, hd) -> (B*S, D).
    ctx4 = ctx.reshape(NUM_HEADS, B, S, HEAD_DIM)
    ctx_full = jnp.concatenate(
        [ctx4[h].reshape(B * S, HEAD_DIM) for h in range(NUM_HEADS)], axis=-1)

    # Single fc_out matmul + bias.
    out = jnp.dot(ctx_full, wo_ref[...],
                  preferred_element_type=jnp.float32) + bo_ref[...]
    o_ref[...] = out.astype(o_ref.dtype)


def reformer_attention(x, wq, bq, wk, bk, wv, bv, wo, bo):
    """x: (B, S, D); weights in PyTorch Linear layout (D_out, D_in), bias (D,)."""
    scale = 1.0 / math.sqrt(HEAD_DIM)
    # Glue (plain JAX, outside the kernel): fuse + pre-transpose the QKV
    # weights and fold the attention scale into the Q columns (constants).
    wqkv = jnp.concatenate([wq.T * scale, wk.T, wv.T], axis=1)       # (D, 3D)
    bqkv = jnp.concatenate([bq * scale, bk, bv]).reshape(1, 3 * D)   # (1, 3D)
    wo_t = wo.T                                                      # (D, D)
    bo2 = bo.reshape(1, D)
    x2 = x.reshape(B * S, D)                 # pack batch*seq onto sublanes

    rows = B * S
    const = lambda i: (0, 0)                 # single grid step, everything resident

    flops = (2 * rows * D * 3 * D                               # fused QKV
             + B * NUM_HEADS * 4 * S * S * HEAD_DIM             # scores + ctx
             + 2 * rows * D * D)                                # fc_out
    transcendentals = B * NUM_HEADS * (S * S + S)               # exp + reciprocal
    bytes_accessed = 4 * (2 * rows * D + D * 3 * D + 3 * D + D * D + D)

    out2 = pl.pallas_call(
        reformer_attn_kernel,
        out_shape=jax.ShapeDtypeStruct((rows, D), x.dtype),
        grid_spec=pltpu.PrefetchScalarGridSpec(
            num_scalar_prefetch=0,
            grid=(1,),                        # one step on every generation
            in_specs=[
                pl.BlockSpec((rows, D), const),     # x rows
                pl.BlockSpec((D, 3 * D), const),    # fused Wqkv (scale folded in)
                pl.BlockSpec((1, 3 * D), const),    # fused bias
                pl.BlockSpec((D, D), const),        # Wo
                pl.BlockSpec((1, D), const),        # bo
            ],
            out_specs=pl.BlockSpec((rows, D), const),
        ),
        compiler_params=pltpu.CompilerParams(
            dimension_semantics=("arbitrary",),
            vmem_limit_bytes=32 * 1024 * 1024),
        cost_estimate=pl.CostEstimate(flops=flops,
                                      transcendentals=transcendentals,
                                      bytes_accessed=bytes_accessed),
    )(x2, wqkv, bqkv, wo_t, bo2)

    return out2.reshape(B, S, D)


def reference_attention(x, wq, bq, wk, bk, wv, bv, wo, bo):
    """Pure-JAX reference matching the PyTorch module (dropout = identity)."""
    q = x @ wq.T + bq
    k = x @ wk.T + bk
    v = x @ wv.T + bv

    def split(t):  # (B, S, D) -> (B, H, S, hd)
        return t.reshape(B, S, NUM_HEADS, HEAD_DIM).transpose(0, 2, 1, 3)

    qh, kh, vh = split(q), split(k), split(v)
    scores = jnp.einsum("bhqd,bhkd->bhqk", qh, kh) / math.sqrt(HEAD_DIM)
    probs = jax.nn.softmax(scores, axis=-1)
    ctx = jnp.einsum("bhqk,bhkd->bhqd", probs, vh)
    ctx = ctx.transpose(0, 2, 1, 3).reshape(B, S, D)
    return ctx @ wo.T + bo


if __name__ == "__main__":
    key = jax.random.PRNGKey(0)
    keys = jax.random.split(key, 9)

    x = jax.random.normal(keys[0], (B, S, D), dtype=jnp.float32)

    def init_w(k):
        return (0.02 * jax.random.normal(k, (D, D))).astype(jnp.float32)

    wq, wk, wv, wo = init_w(keys[1]), init_w(keys[2]), init_w(keys[3]), init_w(keys[4])
    bq = (0.02 * jax.random.normal(keys[5], (D,))).astype(jnp.float32)
    bk = (0.02 * jax.random.normal(keys[6], (D,))).astype(jnp.float32)
    bv = (0.02 * jax.random.normal(keys[7], (D,))).astype(jnp.float32)
    bo = (0.02 * jax.random.normal(keys[8], (D,))).astype(jnp.float32)

    out = reformer_attention(x, wq, bq, wk, bk, wv, bv, wo, bo)
    out = jax.block_until_ready(out)

    ref = reference_attention(x, wq, bq, wk, bk, wv, bv, wo, bo)
    assert out.shape == (B, S, D)
    assert jnp.allclose(out, ref, atol=1e-4, rtol=1e-4), "Pallas output mismatch"

    print("KERNEL_OK")
</pallas_src>

<mosaic_0001>
module attributes {stable_mosaic.version = 11 : i64} {
  func.func @reformer_attn_kernel(%arg0: i32, %arg1: memref<16x32xf32, #tpu.memory_space<vmem>>, %arg2: memref<32x96xf32, #tpu.memory_space<vmem>>, %arg3: memref<1x96xf32, #tpu.memory_space<vmem>>, %arg4: memref<32x32xf32, #tpu.memory_space<vmem>>, %arg5: memref<1x32xf32, #tpu.memory_space<vmem>>, %arg6: memref<16x32xf32, #tpu.memory_space<vmem>>) attributes {dimension_semantics = [#tpu.dimension_semantics<arbitrary>], iteration_bounds = array<i64: 1>, scalar_prefetch = 0 : i64, scratch_operands = 0 : i64, tpu.core_type = #tpu.core_type<tc>, window_params = [{pipeline_mode = #tpu.pipeline_mode<synchronous>, transform_indices = @transform_0, window_bounds = array<i64: 16, 32>}, {pipeline_mode = #tpu.pipeline_mode<synchronous>, transform_indices = @transform_1, window_bounds = array<i64: 32, 96>}, {pipeline_mode = #tpu.pipeline_mode<synchronous>, transform_indices = @transform_2, window_bounds = array<i64: 1, 96>}, {pipeline_mode = #tpu.pipeline_mode<synchronous>, transform_indices = @transform_3, window_bounds = array<i64: 32, 32>}, {pipeline_mode = #tpu.pipeline_mode<synchronous>, transform_indices = @transform_4, window_bounds = array<i64: 1, 32>}, {pipeline_mode = #tpu.pipeline_mode<synchronous>, transform_indices = @transform_5, window_bounds = array<i64: 16, 32>}]} {
    %c0 = arith.constant 0 : index
    %c0_0 = arith.constant 0 : index
    %0 = vector.load %arg1[%c0, %c0_0] : memref<16x32xf32, #tpu.memory_space<vmem>>, vector<16x32xf32>
    %c0_1 = arith.constant 0 : index
    %c0_2 = arith.constant 0 : index
    %1 = vector.load %arg2[%c0_1, %c0_2] : memref<32x96xf32, #tpu.memory_space<vmem>>, vector<32x96xf32>
    %cst = arith.constant dense<0.000000e+00> : vector<16x96xf32>
    %2 = tpu.matmul %0, %1, %cst {dimension_numbers = #tpu.dot_dimension_numbers<[1], [0], [0], [1], [0, 0, 1, 1], [], []>} : vector<16x32xf32>, vector<32x96xf32>, vector<16x96xf32> -> vector<16x96xf32>
    %c0_3 = arith.constant 0 : index
    %c0_4 = arith.constant 0 : index
    %3 = vector.load %arg3[%c0_3, %c0_4] : memref<1x96xf32, #tpu.memory_space<vmem>>, vector<1x96xf32>
    %4 = vector.broadcast %3 : vector<1x96xf32> to vector<16x96xf32>
    %5 = arith.addf %2, %4 : vector<16x96xf32>
    %6 = vector.extract_strided_slice %5 {offsets = [0, 0], sizes = [16, 32], strides = [1, 1]} : vector<16x96xf32> to vector<16x32xf32>
    %7 = vector.extract_strided_slice %5 {offsets = [0, 32], sizes = [16, 32], strides = [1, 1]} : vector<16x96xf32> to vector<16x32xf32>
    %8 = vector.extract_strided_slice %5 {offsets = [0, 64], sizes = [16, 32], strides = [1, 1]} : vector<16x96xf32> to vector<16x32xf32>
    %9 = vector.extract_strided_slice %6 {offsets = [0, 0], sizes = [16, 8], strides = [1, 1]} : vector<16x32xf32> to vector<16x8xf32>
    %10 = vector.shape_cast %9 : vector<16x8xf32> to vector<2x8x8xf32>
    %11 = vector.extract_strided_slice %6 {offsets = [0, 8], sizes = [16, 8], strides = [1, 1]} : vector<16x32xf32> to vector<16x8xf32>
    %12 = vector.shape_cast %11 : vector<16x8xf32> to vector<2x8x8xf32>
    %13 = vector.extract_strided_slice %6 {offsets = [0, 16], sizes = [16, 8], strides = [1, 1]} : vector<16x32xf32> to vector<16x8xf32>
    %14 = vector.shape_cast %13 : vector<16x8xf32> to vector<2x8x8xf32>
    %15 = vector.extract_strided_slice %6 {offsets = [0, 24], sizes = [16, 8], strides = [1, 1]} : vector<16x32xf32> to vector<16x8xf32>
    %16 = vector.shape_cast %15 : vector<16x8xf32> to vector<2x8x8xf32>
    %17 = vector.shape_cast %10 : vector<2x8x8xf32> to vector<1x2x8x8xf32>
    %18 = vector.shape_cast %12 : vector<2x8x8xf32> to vector<1x2x8x8xf32>
    %19 = vector.shape_cast %14 : vector<2x8x8xf32> to vector<1x2x8x8xf32>
    %20 = vector.shape_cast %16 : vector<2x8x8xf32> to vector<1x2x8x8xf32>
    %21 = tpu.concatenate %17, %18, %19, %20 in 0 : vector<1x2x8x8xf32>, vector<1x2x8x8xf32>, vector<1x2x8x8xf32>, vector<1x2x8x8xf32> -> vector<4x2x8x8xf32>
    %22 = vector.shape_cast %21 : vector<4x2x8x8xf32> to vector<8x8x8xf32>
    %23 = vector.extract_strided_slice %7 {offsets = [0, 0], sizes = [16, 8], strides = [1, 1]} : vector<16x32xf32> to vector<16x8xf32>
    %24 = vector.shape_cast %23 : vector<16x8xf32> to vector<2x8x8xf32>
    %25 = vector.extract_strided_slice %7 {offsets = [0, 8], sizes = [16, 8], strides = [1, 1]} : vector<16x32xf32> to vector<16x8xf32>
    %26 = vector.shape_cast %25 : vector<16x8xf32> to vector<2x8x8xf32>
    %27 = vector.extract_strided_slice %7 {offsets = [0, 16], sizes = [16, 8], strides = [1, 1]} : vector<16x32xf32> to vector<16x8xf32>
    %28 = vector.shape_cast %27 : vector<16x8xf32> to vector<2x8x8xf32>
    %29 = vector.extract_strided_slice %7 {offsets = [0, 24], sizes = [16, 8], strides = [1, 1]} : vector<16x32xf32> to vector<16x8xf32>
    %30 = vector.shape_cast %29 : vector<16x8xf32> to vector<2x8x8xf32>
    %31 = vector.shape_cast %24 : vector<2x8x8xf32> to vector<1x2x8x8xf32>
    %32 = vector.shape_cast %26 : vector<2x8x8xf32> to vector<1x2x8x8xf32>
    %33 = vector.shape_cast %28 : vector<2x8x8xf32> to vector<1x2x8x8xf32>
    %34 = vector.shape_cast %30 : vector<2x8x8xf32> to vector<1x2x8x8xf32>
    %35 = tpu.concatenate %31, %32, %33, %34 in 0 : vector<1x2x8x8xf32>, vector<1x2x8x8xf32>, vector<1x2x8x8xf32>, vector<1x2x8x8xf32> -> vector<4x2x8x8xf32>
    %36 = vector.shape_cast %35 : vector<4x2x8x8xf32> to vector<8x8x8xf32>
    %37 = vector.extract_strided_slice %8 {offsets = [0, 0], sizes = [16, 8], strides = [1, 1]} : vector<16x32xf32> to vector<16x8xf32>
    %38 = vector.shape_cast %37 : vector<16x8xf32> to vector<2x8x8xf32>
    %39 = vector.extract_strided_slice %8 {offsets = [0, 8], sizes = [16, 8], strides = [1, 1]} : vector<16x32xf32> to vector<16x8xf32>
    %40 = vector.shape_cast %39 : vector<16x8xf32> to vector<2x8x8xf32>
    %41 = vector.extract_strided_slice %8 {offsets = [0, 16], sizes = [16, 8], strides = [1, 1]} : vector<16x32xf32> to vector<16x8xf32>
    %42 = vector.shape_cast %41 : vector<16x8xf32> to vector<2x8x8xf32>
    %43 = vector.extract_strided_slice %8 {offsets = [0, 24], sizes = [16, 8], strides = [1, 1]} : vector<16x32xf32> to vector<16x8xf32>
    %44 = vector.shape_cast %43 : vector<16x8xf32> to vector<2x8x8xf32>
    %45 = vector.shape_cast %38 : vector<2x8x8xf32> to vector<1x2x8x8xf32>
    %46 = vector.shape_cast %40 : vector<2x8x8xf32> to vector<1x2x8x8xf32>
    %47 = vector.shape_cast %42 : vector<2x8x8xf32> to vector<1x2x8x8xf32>
    %48 = vector.shape_cast %44 : vector<2x8x8xf32> to vector<1x2x8x8xf32>
    %49 = tpu.concatenate %45, %46, %47, %48 in 0 : vector<1x2x8x8xf32>, vector<1x2x8x8xf32>, vector<1x2x8x8xf32>, vector<1x2x8x8xf32> -> vector<4x2x8x8xf32>
    %50 = vector.shape_cast %49 : vector<4x2x8x8xf32> to vector<8x8x8xf32>
    %cst_5 = arith.constant dense<0.000000e+00> : vector<8x8x8xf32>
    %51 = tpu.matmul %22, %36, %cst_5 {dimension_numbers = #tpu.dot_dimension_numbers<[2], [2], [1], [1], [0, 0, 0, 1, 1, 1], [0], [0]>} : vector<8x8x8xf32>, vector<8x8x8xf32>, vector<8x8x8xf32> -> vector<8x8x8xf32>
    %cst_6 = arith.constant dense<0xFF800000> : vector<8x8xf32>
    %52 = vector.multi_reduction <maximumf>, %51, %cst_6 [2] : vector<8x8x8xf32> to vector<8x8xf32>
    %53 = vector.shape_cast %52 : vector<8x8xf32> to vector<8x8x1xf32>
    %54 = vector.broadcast %53 : vector<8x8x1xf32> to vector<8x8x8xf32>
    %55 = arith.subf %51, %54 : vector<8x8x8xf32>
    %56 = math.exp %55 : vector<8x8x8xf32>
    %cst_7 = arith.constant dense<0.000000e+00> : vector<8x8xf32>
    %57 = vector.multi_reduction <add>, %56, %cst_7 [2] : vector<8x8x8xf32> to vector<8x8xf32>
    %58 = vector.shape_cast %57 : vector<8x8xf32> to vector<8x8x1xf32>
    %59 = tpu.reciprocal %58 : vector<8x8x1xf32> -> vector<8x8x1xf32>
    %60 = vector.broadcast %59 : vector<8x8x1xf32> to vector<8x8x8xf32>
    %61 = arith.mulf %56, %60 : vector<8x8x8xf32>
    %cst_8 = arith.constant dense<0.000000e+00> : vector<8x8x8xf32>
    %62 = tpu.matmul %61, %50, %cst_8 {dimension_numbers = #tpu.dot_dimension_numbers<[2], [1], [1], [2], [0, 0, 0, 1, 1, 2], [0], [0]>} : vector<8x8x8xf32>, vector<8x8x8xf32>, vector<8x8x8xf32> -> vector<8x8x8xf32>
    %63 = vector.shape_cast %62 : vector<8x8x8xf32> to vector<4x2x8x8xf32>
    %64 = vector.extract_strided_slice %63 {offsets = [0, 0, 0, 0], sizes = [1, 2, 8, 8], strides = [1, 1, 1, 1]} : vector<4x2x8x8xf32> to vector<1x2x8x8xf32>
    %65 = vector.shape_cast %64 : vector<1x2x8x8xf32> to vector<2x8x8xf32>
    %66 = vector.shape_cast %65 : vector<2x8x8xf32> to vector<16x8xf32>
    %67 = vector.extract_strided_slice %63 {offsets = [1, 0, 0, 0], sizes = [1, 2, 8, 8], strides = [1, 1, 1, 1]} : vector<4x2x8x8xf32> to vector<1x2x8x8xf32>
    %68 = vector.shape_cast %67 : vector<1x2x8x8xf32> to vector<2x8x8xf32>
    %69 = vector.shape_cast %68 : vector<2x8x8xf32> to vector<16x8xf32>
    %70 = vector.extract_strided_slice %63 {offsets = [2, 0, 0, 0], sizes = [1, 2, 8, 8], strides = [1, 1, 1, 1]} : vector<4x2x8x8xf32> to vector<1x2x8x8xf32>
    %71 = vector.shape_cast %70 : vector<1x2x8x8xf32> to vector<2x8x8xf32>
    %72 = vector.shape_cast %71 : vector<2x8x8xf32> to vector<16x8xf32>
    %73 = vector.extract_strided_slice %63 {offsets = [3, 0, 0, 0], sizes = [1, 2, 8, 8], strides = [1, 1, 1, 1]} : vector<4x2x8x8xf32> to vector<1x2x8x8xf32>
    %74 = vector.shape_cast %73 : vector<1x2x8x8xf32> to vector<2x8x8xf32>
    %75 = vector.shape_cast %74 : vector<2x8x8xf32> to vector<16x8xf32>
    %76 = tpu.concatenate %66, %69, %72, %75 in 1 : vector<16x8xf32>, vector<16x8xf32>, vector<16x8xf32>, vector<16x8xf32> -> vector<16x32xf32>
    %c0_9 = arith.constant 0 : index
    %c0_10 = arith.constant 0 : index
    %77 = vector.load %arg4[%c0_9, %c0_10] : memref<32x32xf32, #tpu.memory_space<vmem>>, vector<32x32xf32>
    %cst_11 = arith.constant dense<0.000000e+00> : vector<16x32xf32>
    %78 = tpu.matmul %76, %77, %cst_11 {dimension_numbers = #tpu.dot_dimension_numbers<[1], [0], [0], [1], [0, 0, 1, 1], [], []>} : vector<16x32xf32>, vector<32x32xf32>, vector<16x32xf32> -> vector<16x32xf32>
    %c0_12 = arith.constant 0 : index
    %c0_13 = arith.constant 0 : index
    %79 = vector.load %arg5[%c0_12, %c0_13] : memref<1x32xf32, #tpu.memory_space<vmem>>, vector<1x32xf32>
    %80 = vector.broadcast %79 : vector<1x32xf32> to vector<16x32xf32>
    %81 = arith.addf %78, %80 : vector<16x32xf32>
    %c0_14 = arith.constant 0 : index
    %c0_15 = arith.constant 0 : index
    %82 = vector.load %arg6[%c0_14, %c0_15] : memref<16x32xf32, #tpu.memory_space<vmem>>, vector<16x32xf32>
    tpu.vector_store %arg6[%c0_14, %c0_15], %81 {strides = array<i32>} : memref<16x32xf32, #tpu.memory_space<vmem>>, vector<16x32xf32>,
    return
  }
  func.func @transform_0(%arg0: i32) -> (i32, i32) {
    %c0_i32 = arith.constant 0 : i32
    %c0_i32_0 = arith.constant 0 : i32
    %c0_i32_1 = arith.constant 0 : i32
    return %c0_i32, %c0_i32_0 : i32, i32
  }
  func.func @transform_1(%arg0: i32) -> (i32, i32) {
    %c0_i32 = arith.constant 0 : i32
    %c0_i32_0 = arith.constant 0 : i32
    %c0_i32_1 = arith.constant 0 : i32
    return %c0_i32, %c0_i32_0 : i32, i32
  }
  func.func @transform_2(%arg0: i32) -> (i32, i32) {
    %c0_i32 = arith.constant 0 : i32
    %c0_i32_0 = arith.constant 0 : i32
    %c0_i32_1 = arith.constant 0 : i32
    return %c0_i32, %c0_i32_0 : i32, i32
  }
  func.func @transform_3(%arg0: i32) -> (i32, i32) {
    %c0_i32 = arith.constant 0 : i32
    %c0_i32_0 = arith.constant 0 : i32
    %c0_i32_1 = arith.constant 0 : i32
    return %c0_i32, %c0_i32_0 : i32, i32
  }
  func.func @transform_4(%arg0: i32) -> (i32, i32) {
    %c0_i32 = arith.constant 0 : i32
    %c0_i32_0 = arith.constant 0 : i32
    %c0_i32_1 = arith.constant 0 : i32
    return %c0_i32, %c0_i32_0 : i32, i32
  }
  func.func @transform_5(%arg0: i32) -> (i32, i32) {
    %c0_i32 = arith.constant 0 : i32
    %c0_i32_0 = arith.constant 0 : i32
    %c0_i32_1 = arith.constant 0 : i32
    return %c0_i32, %c0_i32_0 : i32, i32
  }
}

</mosaic_0001>

<bundles_post_ra>
// kernel: tpu_custom_call.1
= control target key start
LH: loop header
LB: loop body
LE: loop exit
PB: predicated region body
PF: predicated region fallthrough
CT: control target
= control target key end

     0   :  { %10 = vsyncpa [#allocation3], 0  ;;  %s1248_s0 = inlined_call_operand.hbm [shape: f32[16,32], index: 0, kind: input, shape index: {}]   ;;  %s1249_s1 = inlined_call_operand.hbm [shape: f32[32,96], index: 1, kind: input, shape index: {}]   ;;  %s1250_s2 = inlined_call_operand.vmem [shape: f32[1,96], index: 2, kind: input, shape index: {}]   ;;  %s1251_s3 = inlined_call_operand.hbm [shape: f32[32,32], index: 3, kind: input, shape index: {}]   ;;  %s1252_s4 = inlined_call_operand.vmem [shape: f32[1,32], index: 4, kind: input, shape index: {}]   ;;  %s1253_s5 = inlined_call_operand.hbm [shape: f32[16,32], index: 5, kind: output, shape index: {}]  }
   0x1   :  { %11 = vsyncpa [#allocation6], 0 }
   0x2   :  { %12 = vsyncpa [#allocation4], 0  ;;  %s30_s20 = sshll.u32 %s1249_s1, 4  ;;  %s1014_s21 = smov [#allocation5]   ;;  %s31_s20 = int_to_ptr.hbm [resolvable:$true] %s30_s20 }
   0x3   :  { %s32_s22 = sshll.u32 %s1014_s21, 4  ;;  %s17_s25 = sshll.u32 %s1248_s0, 4  ;;  %s33_s22 = int_to_ptr.vmem [resolvable:$true] %s32_s22  ;;  %s18_s25 = int_to_ptr.hbm [resolvable:$true] %s17_s25 }
   0x4   :  { %s1015_s26 = smov 128   ;;  %s1016_s27 = smov 8  }
   0x5   :  { %38 = dma.hbm_to_vmem [thread:$0]  %s31_s20, 512, %s33_s22, [#allocation6], %s1015_s26, %s1015_s26, %s1016_s27  }
   0x6   :  { %s1017_s28 = smov [#allocation2]   ;;  %s45_s1 = sshll.u32 %s1251_s3, 4  ;;  %s46_s1 = int_to_ptr.hbm [resolvable:$true] %s45_s1 }
   0x7   :  { %s19_s29 = sshll.u32 %s1017_s28, 4  ;;  %s1018_s0 = smov [#allocation7]   ;;  %s20_s29 = int_to_ptr.vmem [resolvable:$true] %s19_s29 }
   0x8   :  { %25 = dma.hbm_to_vmem [thread:$0]  %s18_s25, 256, %s20_s29, [#allocation3], %s1015_s26, %s1015_s26, %s1016_s27  }
   0x9   :  { %s47_s7 = sshll.u32 %s1018_s0, 4  ;;  %s48_s7 = int_to_ptr.vmem [resolvable:$true] %s47_s7 }
   0xa   :  { %53 = dma.hbm_to_vmem [thread:$0]  %s46_s1, 512, %s48_s7, [#allocation6], %s1015_s26, %s1015_s26, %s1016_s27  }
   0xb   :  { %1008 = dma.done.wait [#allocation3], 256  }
   0xc   :  { %1009 = vsyncadd [#allocation3], 4294967040 }
   0xd   :  { %1010 = dma.done.wait [#allocation6], 1024  }
   0xe   :  { %1011 = vsyncadd [#allocation6], 4294966272  ;;  %v73_v0 = vld [vmem:[#allocation5 + $0x18] sm:$0xff]  ;;  %v72_v1 = vld [vmem:[#allocation5 + $0x10] sm:$0xff]  ;;  %vm78_vm0 = vcmask 261120   ;;  %s1019_s9 = smov 104  }
   0xf   :  { %97 = vmatpush.msra.mxu0 %v73_v0  ;;  %v71_v2 = vld [vmem:[#allocation5 + $0x8] sm:$0xff]  ;;  %v70_v3 = vld [vmem:[#allocation5] sm:$0xff]  ;;  %v68_v4 = vld [vmem:[#allocation2] sm:$0xff]  ;;  %s1020_s10 = smov 112   ;;  %s1021_s11 = smov 120   ;;  %vm124_vm1 = vcmask 64512  }
  0x10   :  { %v69_v5 = vld [vmem:[#allocation2 + $0x8] sm:$0xff]  ;;  %v878_v6 = vld [vmem:[%s1250_s2] ss:$0 sm:$0xff]  ;;  %s1022_s2 = smov 96   ;;  %s1023_s12 = smov 64  }
  0x11   :  { %98 = vmatpush.msra.mxu0 %v72_v1  ;;  %s1024_s13 = smov 16   ;;  %s1025_s14 = smov 24  }
  0x12   :  { %s1026_s17 = smov [#allocation8]   ;;  %s808_s21 = sshll.u32 %s1253_s5, 4  ;;  %s809_s21 = int_to_ptr.hbm [resolvable:$true] %s808_s21 }
  0x13   :  { %99 = vmatpush.msra.mxu0 %v71_v2  ;;  %s806_s18 = sshll.u32 %s1026_s17, 4  ;;  %s807_s18 = int_to_ptr.vmem [resolvable:$true] %s806_s18 }
  0x15   :  { %100 = vmatpush.msra.mxu0 %v70_v3 }
  0x16   :  { %822 = vmatmul.msk.f32.vlgmr.msra.gmra.mxu0 %vm78_vm0, %v68_v4 }
  0x1e   :  { %823 = vmatmul.msk.f32.gmra.mxu0 %vm78_vm0, %v69_v5 }
  0x93   :  { %v102_v7 = vpop.f32.mrf.mxu0 }
  0x94   :  { %v1080_v8 = vadd.f32 %v878_v6, %v102_v7 }
  0x96   :  { %118 = vrot.lane.b32.xlu2 %v1080_v8, %s1019_s9  ;;  %114 = vrot.lane.b32.xlu0 %v1080_v8, %s1020_s10 }
  0x9b   :  { %v105_v9 = vpop.f32.mrf.mxu0 }
  0x9c   :  { %v1084_v10 = vadd.f32 %v878_v6, %v105_v9 }
  0x9e   :  { %112 = vrot.lane.b32.xlu1 %v1084_v10, %s1021_s11  ;;  %116 = vrot.lane.b32.xlu2 %v1084_v10, %s1020_s10 }
  0x9f   :  { %110 = vrot.lane.b32.xlu0 %v1080_v8, %s1021_s11 }
  0xa6   :  { %120 = vrot.lane.b32.xlu1 %v1084_v10, %s1019_s9 }
  0xa7   :  { %149 = vrot.lane.b32.xlu0 %v1084_v10, %s1022_s2 }
  0xae   :  { %122 = vrot.lane.b32.xlu1 %v1080_v8, %s1022_s2 }
  0xf0   :  { %v1095_v12 = vpop.permute.xlu2 %118 }
  0xf8   :  { %v1100_v15 = vpop.permute.xlu2 %116 }
 0x108   :  { %v1092_v11 = vpop.permute.xlu0 %114 }
 0x109   :  { %227 = vrot.lane.b32.xlu2 %v1092_v11, %s1022_s2 }
 0x110   :  { %v1097_v13 = vpop.permute.xlu1 %112 }
 0x111   :  { %v111_v14 = vpop.permute.xlu0 %110  ;;  %201 = vrot.lane.b32.xlu1 %v1097_v13, %s1022_s2  ;;  %v868_v47 = vpack.i.bf16 %v1097_v13, %v1092_v11 }
 0x112   :  { %175 = vrot.lane.b32.xlu0 %v111_v14, %s1022_s2  ;;  %v863_v38 = vpack.i.bf16 %v111_v14, %v1080_v8 }
 0x118   :  { %v1102_v16 = vpop.permute.xlu1 %120 }
 0x119   :  { %v150_v17 = vpop.permute.xlu0 %149  ;;  %253 = vrot.lane.b32.xlu1 %v1100_v15, %s1022_s2  ;;  %305 = vrot.lane.b32.xlu2 %v1102_v16, %s1022_s2 }
 0x11a   :  { %279 = vrot.lane.b32.xlu0 %v1095_v12, %s1022_s2  ;;  %826 = vmatpush.xpose.msk.msra.mxu2 %vm124_vm1, %v150_v17 }
 0x11d   :  { %827 = vmatmul.msk.f32.vlgmr.msra.gmra.mxu2 %vm124_vm1, %v1084_v10 }
 0x120   :  { %v123_v18 = vpop.permute.xlu1 %122 }
 0x121   :  { %824 = vmatpush.xpose.msk.msra.mxu1 %vm124_vm1, %v123_v18 }
 0x124   :  { %825 = vmatmul.msk.f32.vlgmr.msra.gmra.mxu1 %vm124_vm1, %v1080_v8 }
 0x163   :  { %v228_v19 = vpop.permute.xlu2 %227 }
 0x164   :  { %832 = vmatpush.xpose.msk.msrb.mxu2 %vm124_vm1, %v228_v19 }
 0x167   :  { %833 = vmatmul.msk.f32.vlgmr.msrb.gmra.mxu2 %vm124_vm1, %v1092_v11 }
 0x173   :  { %v306_v20 = vpop.permute.xlu2 %305 }
 0x174   :  { %838 = vmatpush.xpose.msk.msra.mxu2 %vm124_vm1, %v306_v20 }
 0x177   :  { %839 = vmatmul.msk.f32.vlgmr.msra.gmra.mxu2 %vm124_vm1, %v1102_v16 }
 0x183   :  { %v202_v21 = vpop.permute.xlu1 %201 }
 0x184   :  { %v176_v22 = vpop.permute.xlu0 %175  ;;  %830 = vmatpush.xpose.msk.msrb.mxu1 %vm124_vm1, %v202_v21 }
 0x185   :  { %828 = vmatpush.xpose.msk.msrb.mxu0 %vm124_vm1, %v176_v22 }
 0x187   :  { %831 = vmatmul.msk.f32.vlgmr.msrb.gmra.mxu1 %vm124_vm1, %v1097_v13 }
 0x188   :  { %829 = vmatmul.msk.f32.vlgmr.msrb.gmra.mxu0 %vm124_vm1, %v111_v14 }
 0x18b   :  { %v254_v23 = vpop.permute.xlu1 %253 }
 0x18c   :  { %v280_v24 = vpop.permute.xlu0 %279  ;;  %834 = vmatpush.xpose.msk.msra.mxu3 %vm124_vm1, %v254_v23 }
 0x18d   :  { %836 = vmatpush.xpose.msk.msra.mxu1 %vm124_vm1, %v280_v24 }
 0x18f   :  { %835 = vmatmul.msk.f32.vlgmr.msra.gmra.mxu3 %vm124_vm1, %v1100_v15 }
 0x190   :  { %837 = vmatmul.msk.f32.vlgmr.msra.gmra.mxu1 %vm124_vm1, %v1095_v12 }
 0x1a0   :  { %v172_v27 = vpop.f32.mrf.mxu2 }
 0x1a1   :  { %v146_v25 = vpop.f32.mrf.mxu1  ;;  %v334_v36 = vsel %vm124_vm1, %v172_v27, -inf }
 0x1a2   :  { %v331_v26 = vsel %vm124_vm1, %v146_v25, -inf }
 0x1a3   :  { %332 = vmax.xlane.f32.xlu2 %v331_v26 }
 0x1ea   :  { %v250_v28 = vpop.f32.mrf.mxu2 }
 0x1eb   :  { %v343_v29 = vsel %vm124_vm1, %v250_v28, -inf }
 0x1ec   :  { %344 = vmax.xlane.f32.xlu1 %v343_v29 }
 0x1fa   :  { %v328_v30 = vpop.f32.mrf.mxu2 }
 0x1fb   :  { %v352_v31 = vsel %vm124_vm1, %v328_v30, -inf }
 0x1fc   :  { %353 = vmax.xlane.f32.xlu1 %v352_v31 }
 0x204   :  { %v224_v32 = vpop.f32.mrf.mxu1 }
 0x205   :  { %v198_v33 = vpop.f32.mrf.mxu0  ;;  %v340_v34 = vsel %vm124_vm1, %v224_v32, -inf }
 0x206   :  { %341 = vmax.xlane.f32.xlu2 %v340_v34  ;;  %v337_v35 = vsel %vm124_vm1, %v198_v33, -inf }
 0x207   :  { %338 = vmax.xlane.f32.xlu0 %v337_v35 }
 0x20d   :  { %v302_v45 = vpop.f32.mrf.mxu1 }
 0x20e   :  { %335 = vmax.xlane.f32.xlu2 %v334_v36  ;;  %v349_v46 = vsel %vm124_vm1, %v302_v45, -inf }
 0x212   :  { %v276_v37 = vpop.f32.mrf.mxu3 }
 0x213   :  { %v346_v39 = vsel %vm124_vm1, %v276_v37, -inf }
 0x215   :  { %864 = vrot.lane.b32.xlu1 %v863_v38, %s1023_s12 }
 0x216   :  { %v333_v40 = vpop.xlane.xlu2 %332  ;;  %347 = vmax.xlane.f32.xlu2 %v346_v39 }
 0x217   :  { %v355_v41 = vsub.f32 %v146_v25, %v333_v40  ;;  %v873_v40 = vpack.i.bf16 %v1095_v12, %v1084_v10 }
 0x219   :  { %v363_v42 = vmul.f32 1.442695, %v355_v41 }
 0x21b   :  { %880 = vpow2.f32 %v363_v42 }
 0x221   :  { %v1139_v43 = vpop.eup %880 }
 0x222   :  { %v379_v44 = vsel %vm124_vm1, %v1139_v43, 0.0 }
 0x223   :  { %380 = vadd.xlane.f32.xlu0 %v379_v44 }
 0x22b   :  { %350 = vmax.xlane.f32.xlu0 %v349_v46 }
 0x23f   :  { %869 = vrot.lane.b32.xlu0 %v868_v47, %s1023_s12 }
 0x25f   :  { %v345_v48 = vpop.xlane.xlu1 %344 }
 0x260   :  { %v359_v49 = vsub.f32 %v250_v28, %v345_v48 }
 0x262   :  { %v371_v50 = vmul.f32 1.442695, %v359_v49 }
 0x264   :  { %882 = vpow2.f32 %v371_v50 }
 0x26a   :  { %v1147_v51 = vpop.eup %882 }
 0x26b   :  { %v391_v52 = vsel %vm124_vm1, %v1147_v51, 0.0 }
 0x26c   :  { %392 = vadd.xlane.f32.xlu2 %v391_v52 }
 0x26f   :  { %v354_v53 = vpop.xlane.xlu1 %353 }
 0x270   :  { %v362_v56 = vsub.f32 %v328_v30, %v354_v53 }
 0x272   :  { %v377_v58 = vmul.f32 1.442695, %v362_v56 }
 0x279   :  { %v342_v54 = vpop.xlane.xlu2 %341 }
 0x27a   :  { %v358_v55 = vsub.f32 %v224_v32, %v342_v54  ;;  %v339_v59 = vpop.xlane.xlu0 %338 }
 0x27b   :  { %v357_v63 = vsub.f32 %v198_v33, %v339_v59 }
 0x27c   :  { %v369_v57 = vmul.f32 1.442695, %v358_v55 }
 0x27d   :  { %v367_v3 = vmul.f32 1.442695, %v357_v63 }
 0x27e   :  { %884 = vpow2.f32 %v369_v57 }
 0x27f   :  { %886 = vpow2.f32 %v377_v58 }
 0x281   :  { %v336_v60 = vpop.xlane.xlu2 %335 }
 0x282   :  { %v356_v61 = vsub.f32 %v172_v27, %v336_v60 }
 0x284   :  { %v1151_v62 = vpop.eup %884  ;;  %v365_v0 = vmul.f32 1.442695, %v356_v61 }
 0x285   :  { %v388_v1 = vsel %vm124_vm1, %v1151_v62, 0.0  ;;  %v1155_v7 = vpop.eup %886 }
 0x286   :  { %888 = vpow2.f32 %v365_v0  ;;  %389 = vadd.xlane.f32.xlu0 %v388_v1  ;;  %v400_v14 = vsel %vm124_vm1, %v1155_v7, 0.0 }
 0x287   :  { %v865_v2 = vpop.permute.xlu1 %864  ;;  %890 = vpow2.f32 %v367_v3 }
 0x288   :  { %v867_v4 = vunpack.i.h.bf16 %v865_v2  ;;  %v866_v5 = vunpack.i.l.bf16 %v865_v2 }
 0x289   :  { %v348_v6 = vpop.xlane.xlu2 %347 }
 0x28a   :  { %v360_v8 = vsub.f32 %v276_v37, %v348_v6  ;;  %544 = vmatpush.msrb.mxu3 %v866_v5  ;;  %596 = vmatpush.msrb.mxu1 %v867_v4 }
 0x28c   :  { %v1157_v9 = vpop.eup %888  ;;  %v373_v11 = vmul.f32 1.442695, %v360_v8 }
 0x28d   :  { %v382_v13 = vsel %vm124_vm1, %v1157_v9, 0.0  ;;  %v1163_v17 = vpop.eup %890 }
 0x28e   :  { %892 = vpow2.f32 %v373_v11  ;;  %383 = vadd.xlane.f32.xlu1 %v382_v13  ;;  %401 = vadd.xlane.f32.xlu0 %v400_v14  ;;  %v385_v20 = vsel %vm124_vm1, %v1163_v17, 0.0 }
 0x294   :  { %v1165_v18 = vpop.eup %892 }
 0x295   :  { %v394_v19 = vsel %vm124_vm1, %v1165_v18, 0.0 }
 0x296   :  { %395 = vadd.xlane.f32.xlu2 %v394_v19  ;;  %386 = vadd.xlane.f32.xlu1 %v385_v20  ;;  %v381_v21 = vpop.xlane.xlu0 %380 }
 0x297   :  { %894 = vrcp.f32 %v381_v21  ;;  %v414_v27 = vand.u32 2147483648, %v381_v21  ;;  %v412_v30 = vand.u32 2147483647, %v381_v21  ;;  %vm408_vm3 = vweird.f32 %v381_v21 }
 0x299   :  { %v415_v32 = vor.u32 1.1754944e-38, %v414_v27  ;;  %vm413_vm5 = vcmp.eq.f32.partialorder %v412_v30, 8.507059e+37 }
 0x29d   :  { %v895_v22 = vpop.eup %894 }
 0x29e   :  { %v404_v23 = vmul.f32 %v895_v22, %v381_v21  ;;  %v351_v24 = vpop.xlane.xlu0 %350  ;;  %vm409_vm2 = vweird.f32 %v895_v22 }
 0x29f   :  { %v361_v25 = vsub.f32 %v302_v45, %v351_v24  ;;  %vm410_vm4 = vmor %vm408_vm3, %vm409_vm2 }
 0x2a0   :  { %v405_v26 = vsub.f32 1.0, %v404_v23 }
 0x2a1   :  { %v375_v28 = vmul.f32 1.442695, %v361_v25 }
 0x2a2   :  { %v406_v29 = vmul.f32 %v895_v22, %v405_v26  ;;  %653 = vrot.lane.b32.xlu0 %v1100_v15, %s1023_s12 }
 0x2a3   :  { %896 = vpow2.f32 %v375_v28 }
 0x2a4   :  { %v407_v31 = vadd.f32 %v895_v22, %v406_v29 }
 0x2a6   :  { %v411_v33 = vsel %vm410_vm4, %v895_v22, %v407_v31 }
 0x2a7   :  { %v416_v34 = vsel %vm413_vm5, %v415_v32, %v411_v33 }
 0x2a8   :  { %v515_v35 = vmul.f32 %v1139_v43, %v416_v34 }
 0x2a9   :  { %v1174_v36 = vpop.eup %896 }
 0x2aa   :  { %840 = vmatmul.msk.f32.vlgmr.msrb.gmra.mxu3 %vm124_vm1, %v515_v35  ;;  %v397_v37 = vsel %vm124_vm1, %v1174_v36, 0.0 }
 0x2ab   :  { %398 = vadd.xlane.f32.xlu2 %v397_v37 }
 0x2af   :  { %705 = vrot.lane.b32.xlu1 %v1102_v16, %s1023_s12 }
 0x2b1   :  { %v870_v15 = vpop.permute.xlu0 %869 }
 0x2b2   :  { %v872_v38 = vunpack.i.h.bf16 %v870_v15  ;;  %v871_v39 = vunpack.i.l.bf16 %v870_v15 }
 0x2b4   :  { %622 = vmatpush.msrb.mxu2 %v872_v38  ;;  %648 = vmatpush.msra.mxu3 %v871_v39 }
 0x2c3   :  { %874 = vrot.lane.b32.xlu2 %v873_v40, %s1023_s12 }
 0x2df   :  { %v393_v41 = vpop.xlane.xlu2 %392 }
 0x2e0   :  { %898 = vrcp.f32 %v393_v41  ;;  %v470_v45 = vand.u32 2147483648, %v393_v41  ;;  %v468_v47 = vand.u32 2147483647, %v393_v41  ;;  %vm464_vm7 = vweird.f32 %v393_v41 }
 0x2e2   :  { %v471_v48 = vor.u32 1.1754944e-38, %v470_v45  ;;  %vm469_vm9 = vcmp.eq.f32.partialorder %v468_v47, 8.507059e+37 }
 0x2e6   :  { %v899_v42 = vpop.eup %898 }
 0x2e7   :  { %v460_v43 = vmul.f32 %v899_v42, %v393_v41  ;;  %vm465_vm6 = vweird.f32 %v899_v42 }
 0x2e8   :  { %vm466_vm8 = vmor %vm464_vm7, %vm465_vm6 }
 0x2e9   :  { %v461_v44 = vsub.f32 1.0, %v460_v43 }
 0x2eb   :  { %v462_v46 = vmul.f32 %v899_v42, %v461_v44 }
 0x2ed   :  { %v463_v16 = vadd.f32 %v899_v42, %v462_v46 }
 0x2ef   :  { %v467_v49 = vsel %vm466_vm8, %v899_v42, %v463_v16 }
 0x2f0   :  { %v472_v50 = vsel %vm469_vm9, %v471_v48, %v467_v49 }
 0x2f1   :  { %v519_v10 = vmul.f32 %v1147_v51, %v472_v50 }
 0x2f3   :  { %844 = vmatmul.msk.f32.vlgmr.msra.gmra.mxu3 %vm124_vm1, %v519_v10 }
 0x2f9   :  { %v390_v12 = vpop.xlane.xlu0 %389 }
 0x2fa   :  { %900 = vrcp.f32 %v390_v12  ;;  %v456_v58 = vand.u32 2147483648, %v390_v12  ;;  %v454_v59 = vand.u32 2147483647, %v390_v12  ;;  %vm450_vm11 = vweird.f32 %v390_v12 }
 0x2fc   :  { %v457_v63 = vor.u32 1.1754944e-38, %v456_v58  ;;  %vm455_vm13 = vcmp.eq.f32.partialorder %v454_v59, 8.507059e+37 }
 0x300   :  { %v901_v52 = vpop.eup %900 }
 0x301   :  { %v446_v53 = vmul.f32 %v901_v52, %v390_v12  ;;  %v1186_v54 = vpop.xlane.xlu1 %383  ;;  %v402_v55 = vpop.xlane.xlu0 %401  ;;  %vm451_vm10 = vweird.f32 %v901_v52 }
 0x302   :  { %902 = vrcp.f32 %v402_v55  ;;  %vm452_vm12 = vmor %vm450_vm11, %vm451_vm10  ;;  %vm506_vm2 = vweird.f32 %v402_v55  ;;  %v512_v25 = vand.u32 2147483648, %v402_v55  ;;  %v510_v27 = vand.u32 2147483647, %v402_v55 }
 0x303   :  { %v447_v56 = vsub.f32 1.0, %v446_v53  ;;  %904 = vrcp.f32 %v1186_v54  ;;  %v428_v41 = vand.u32 2147483648, %v1186_v54  ;;  %vm422_vm9 = vweird.f32 %v1186_v54 }
 0x304   :  { %v513_v34 = vor.u32 1.1754944e-38, %v512_v25  ;;  %vm511_vm7 = vcmp.eq.f32.partialorder %v510_v27, 8.507059e+37  ;;  %v426_v42 = vand.u32 2147483647, %v1186_v54 }
 0x305   :  { %v448_v57 = vmul.f32 %v901_v52, %v447_v56  ;;  %v429_v46 = vor.u32 1.1754944e-38, %v428_v41 }
 0x306   :  { %vm427_vm11 = vcmp.eq.f32.partialorder %v426_v42, 8.507059e+37 }
 0x307   :  { %v449_v60 = vadd.f32 %v901_v52, %v448_v57 }
 0x308   :  { %v903_v61 = vpop.eup %902 }
 0x309   :  { %v453_v51 = vsel %vm452_vm12, %v901_v52, %v449_v60  ;;  %v387_v0 = vpop.xlane.xlu1 %386  ;;  %v502_v2 = vmul.f32 %v903_v61, %v402_v55  ;;  %v1189_v3 = vpop.xlane.xlu2 %395  ;;  %vm507_vm14 = vweird.f32 %v903_v61 }
 0x30a   :  { %v458_v1 = vsel %vm455_vm13, %v457_v63, %v453_v51  ;;  %906 = vrcp.f32 %v387_v0  ;;  %v905_v5 = vpop.eup %904  ;;  %v442_v21 = vand.u32 2147483648, %v387_v0  ;;  %vm1197_vm3 = vmor %vm506_vm2, %vm507_vm14  ;;  %vm436_vm4 = vweird.f32 %v387_v0 }
 0x30b   :  { %v518_v4 = vmul.f32 %v1151_v62, %v458_v1  ;;  %v503_v6 = vsub.f32 1.0, %v502_v2  ;;  %908 = vrcp.f32 %v1189_v3  ;;  %v418_v11 = vmul.f32 %v905_v5, %v1186_v54 }
 0x30c   :  { %v440_v62 = vand.u32 2147483647, %v387_v0  ;;  %v443_v31 = vor.u32 1.1754944e-38, %v442_v21  ;;  %vm423_vm8 = vweird.f32 %v905_v5  ;;  %v484_v10 = vand.u32 2147483648, %v1189_v3  ;;  %v763_v21 = vld [vmem:[#allocation7] sm:$0xff] }
 0x30d   :  { %843 = vmatmul.msk.f32.vlgmr.msrb.gmra.mxu2 %vm124_vm1, %v518_v4  ;;  %v504_v13 = vmul.f32 %v903_v61, %v503_v6  ;;  %v419_v20 = vsub.f32 1.0, %v418_v11  ;;  %vm424_vm10 = vmor %vm422_vm9, %vm423_vm8  ;;  %vm478_vm13 = vweird.f32 %v1189_v3  ;;  %v482_v52 = vand.u32 2147483647, %v1189_v3 }
 0x30e   :  { %vm441_vm6 = vcmp.eq.f32.partialorder %v440_v62, 8.507059e+37 }
 0x30f   :  { %v505_v23 = vadd.f32 %v903_v61, %v504_v13  ;;  %v420_v29 = vmul.f32 %v905_v5, %v419_v20  ;;  %vm483_vm2 = vcmp.eq.f32.partialorder %v482_v52, 8.507059e+37  ;;  %v764_v20 = vld [vmem:[#allocation7 + $0x8] sm:$0xff] }
 0x310   :  { %v907_v8 = vpop.eup %906 }
 0x311   :  { %v432_v14 = vmul.f32 %v907_v8, %v387_v0  ;;  %v1195_v22 = vpop.eup %908  ;;  %vm437_vm15 = vweird.f32 %v907_v8  ;;  %v509_v32 = vsel %vm1197_vm3, %v903_v61, %v505_v23  ;;  %v421_v15 = vadd.f32 %v905_v5, %v420_v29 }
 0x312   :  { %v474_v30 = vmul.f32 %v1195_v22, %v1189_v3  ;;  %vm438_vm5 = vmor %vm436_vm4, %vm437_vm15  ;;  %v514_v38 = vsel %vm511_vm7, %v513_v34, %v509_v32  ;;  %vm479_vm12 = vweird.f32 %v1195_v22  ;;  %v485_v61 = vor.u32 1.1754944e-38, %v484_v10 }
 0x313   :  { %v433_v19 = vsub.f32 1.0, %v432_v14  ;;  %v522_v44 = vmul.f32 %v1155_v7, %v514_v38  ;;  %v425_v45 = vsel %vm424_vm10, %v905_v5, %v421_v15  ;;  %vm1219_vm14 = vmor %vm478_vm13, %vm479_vm12  ;;  %vm760_vm7 = vcmask 195584  }
 0x314   :  { %v475_v39 = vsub.f32 1.0, %v474_v30  ;;  %v430_v16 = vsel %vm427_vm11, %v429_v46, %v425_v45  ;;  %v654_v58 = vpop.permute.xlu0 %653 }
 0x315   :  { %v434_v24 = vmul.f32 %v907_v8, %v433_v19  ;;  %v516_v54 = vmul.f32 %v1157_v9, %v430_v16  ;;  %v765_v19 = vld [vmem:[#allocation7 + $0x10] sm:$0xff] }
 0x317   :  { %v435_v28 = vadd.f32 %v907_v8, %v434_v24 }
 0x319   :  { %v439_v33 = vsel %vm438_vm5, %v907_v8, %v435_v28 }
 0x31a   :  { %v444_v35 = vsel %vm441_vm6, %v443_v31, %v439_v33  ;;  %vm757_vm6 = vcmask 130048   ;;  %v879_v33 = vld [vmem:[%s1252_s4] ss:$0 sm:$0xff] }
 0x31b   :  { %v517_v37 = vmul.f32 %v1163_v17, %v444_v35  ;;  %v476_v17 = vmul.f32 %v1195_v22, %v475_v39 }
 0x31d   :  { %842 = vmatmul.msk.f32.vlgmr.msrb.gmra.mxu1 %vm124_vm1, %v517_v37  ;;  %v477_v48 = vadd.f32 %v1195_v22, %v476_v17 }
 0x31e   :  { %v399_v40 = vpop.xlane.xlu2 %398 }
 0x31f   :  { %910 = vrcp.f32 %v399_v40  ;;  %v498_v56 = vand.u32 2147483648, %v399_v40  ;;  %v481_v57 = vsel %vm1219_vm14, %v1195_v22, %v477_v48  ;;  %v496_v60 = vand.u32 2147483647, %v399_v40 }
 0x320   :  { %vm492_vm3 = vweird.f32 %v399_v40  ;;  %v486_v51 = vsel %vm483_vm2, %v485_v61, %v481_v57 }
 0x321   :  { %v706_v43 = vpop.permute.xlu1 %705  ;;  %v499_v63 = vor.u32 1.1754944e-38, %v498_v56  ;;  %vm497_vm5 = vcmp.eq.f32.partialorder %v496_v60, 8.507059e+37  ;;  %v520_v2 = vmul.f32 %v1165_v18, %v486_v51 }
 0x322   :  { %726 = vmatpush.msra.mxu2 %v706_v43 }
 0x323   :  { %847 = vmatmul.msk.f32.vlgmr.msra.gmra.mxu2 %vm124_vm1, %v522_v44 }
 0x325   :  { %v911_v47 = vpop.eup %910 }
 0x326   :  { %v488_v49 = vmul.f32 %v911_v47, %v399_v40  ;;  %v875_v50 = vpop.permute.xlu2 %874  ;;  %vm493_vm15 = vweird.f32 %v911_v47 }
 0x327   :  { %v877_v12 = vunpack.i.h.bf16 %v875_v50  ;;  %v876_v7 = vunpack.i.l.bf16 %v875_v50  ;;  %vm494_vm4 = vmor %vm492_vm3, %vm493_vm15 }
 0x328   :  { %v489_v53 = vsub.f32 1.0, %v488_v49 }
 0x329   :  { %570 = vmatpush.msra.mxu0 %v876_v7  ;;  %700 = vmatpush.msra.mxu1 %v877_v12 }
 0x32a   :  { %v490_v59 = vmul.f32 %v911_v47, %v489_v53  ;;  %841 = vmatmul.msk.f32.vlgmr.msra.gmra.mxu0 %vm124_vm1, %v516_v54 }
 0x32b   :  { %674 = vmatpush.msrb.mxu0 %v654_v58 }
 0x32c   :  { %v491_v9 = vadd.f32 %v911_v47, %v490_v59 }
 0x32d   :  { %v546_v4 = vpop.f32.mrf.mxu3 }
 0x32e   :  { %v495_v0 = vsel %vm494_vm4, %v911_v47, %v491_v9 }
 0x32f   :  { %v500_v1 = vsel %vm497_vm5, %v499_v63, %v495_v0 }
 0x330   :  { %v521_v3 = vmul.f32 %v1174_v36, %v500_v1  ;;  %v766_v36 = vld [vmem:[#allocation7 + $0x18] sm:$0xff] }
 0x331   :  { %789 = vmatpush.msrb.mxu3 %v766_v36 }
 0x332   :  { %845 = vmatmul.msk.f32.vlgmr.msrb.gmra.mxu0 %vm124_vm1, %v520_v2  ;;  %846 = vmatmul.msk.f32.vlgmr.msra.gmra.mxu1 %vm124_vm1, %v521_v3 }
 0x333   :  { %790 = vmatpush.msrb.mxu3 %v765_v19 }
 0x335   :  { %791 = vmatpush.msrb.mxu3 %v764_v20 }
 0x337   :  { %792 = vmatpush.msrb.mxu3 %v763_v21 }
 0x376   :  { %v650_v5 = vpop.f32.mrf.mxu3 }
 0x377   :  { %741 = vrot.lane.b32.xlu0 %v650_v5, %s1024_s13 }
 0x390   :  { %v624_v8 = vpop.f32.mrf.mxu2 }
 0x39a   :  { %v598_v6 = vpop.f32.mrf.mxu1 }
 0x39b   :  { %733 = vrot.lane.b32.xlu1 %v598_v6, %s1016_s27 }
 0x3a3   :  { %735 = vrot.lane.b32.xlu1 %v624_v8, %s1016_s27 }
 0x3a6   :  { %v728_v18 = vpop.f32.mrf.mxu2 }
 0x3a7   :  { %v572_v11 = vpop.f32.mrf.mxu0 }
 0x3af   :  { %v676_v13 = vpop.f32.mrf.mxu0  ;;  %v702_v14 = vpop.f32.mrf.mxu1 }
 0x3b0   :  { %749 = vrot.lane.b32.xlu2 %v702_v14, %s1025_s14  ;;  %743 = vrot.lane.b32.xlu0 %v676_v13, %s1024_s13 }
 0x3b8   :  { %751 = vrot.lane.b32.xlu2 %v728_v18, %s1025_s14 }
 0x3e9   :  { %v742_v23 = vpop.permute.xlu0 %741 }
 0x40a   :  { %v750_v62 = vpop.permute.xlu2 %749 }
 0x40d   :  { %v734_v22 = vpop.permute.xlu1 %733 }
 0x40e   :  { %v755_v24 = vsel %vm124_vm1, %v546_v4, %v734_v22 }
 0x40f   :  { %v758_v25 = vsel %vm757_vm6, %v755_v24, %v742_v23 }
 0x410   :  { %v761_v26 = vsel %vm760_vm7, %v758_v25, %v750_v62 }
 0x411   :  { %848 = vmatmul.msk.f32.vlgmr.msrb.gmra.mxu3 %vm78_vm0, %v761_v26 }
 0x412   :  { %v752_v30 = vpop.permute.xlu2 %751 }
 0x415   :  { %v736_v27 = vpop.permute.xlu1 %735 }
 0x416   :  { %v756_v28 = vsel %vm124_vm1, %v572_v11, %v736_v27 }
 0x422   :  { %v744_v29 = vpop.permute.xlu0 %743 }
 0x423   :  { %v759_v31 = vsel %vm757_vm6, %v756_v28, %v744_v29 }
 0x424   :  { %v762_v32 = vsel %vm760_vm7, %v759_v31, %v752_v30 }
 0x425   :  { %849 = vmatmul.msk.f32.gmra.mxu3 %vm78_vm0, %v762_v32 }
 0x494   :  { %v794_v34 = vpop.f32.mrf.mxu3 }
 0x495   :  { %v795_v35 = vadd.f32 %v879_v33, %v794_v34 }
 0x497   :  { %800 = vst.msk [vmem:[#allocation8] sm:$0xff] %vm78_vm0, %v795_v35 }
 0x4a8   :  { %v797_v37 = vpop.f32.mrf.mxu3 }
 0x4a9   :  { %v798_v15 = vadd.f32 %v879_v33, %v797_v37 }
 0x4ab   :  { %801 = vst.msk [vmem:[#allocation8 + $0x8] sm:$0xff] %vm78_vm0, %v798_v15 }
 0x4ac   :  { %814 = dma.vmem_to_hbm [thread:$0]  %s807_s18, 256, %s809_s21, [#allocation4], %s1015_s26, %s1015_s26, %s1016_s27  }
 0x4ad   :  { %1012 = dma.done.wait [#allocation4], 256  }
 0x4ae   :  { %1013 = vsyncadd [#allocation4], 4294967040 }
 0x4af   :  { %819 = vsyncpa [#allocation3], 1 }
 0x4b0   :  { %820 = vsyncpa [#allocation6], 1 }
 0x4b1   :  { %821 = vsyncpa [#allocation4], 1 }

</bundles_post_ra>
